<compile_context>
chip_gen: v7x
topology: tpu7x:2x2x1
jax: 0.10.0
libtpu: 0.0.40
codegen_flags: <defaults>
</compile_context>

<pallas_src>
import jax
import jax.numpy as jnp
import numpy as np
from jax.experimental import pallas as pl
from jax.experimental.pallas import tpu as pltpu


# ----------------------------------------------------------------------------
# Kernel
# ----------------------------------------------------------------------------
def _make_reward_kernel(TB, TS, ACC_LANES):
    n_chunks = TS // ACC_LANES

    def kernel(thresh_ref, logp_ref, rew_ref, out_ref, acc_ref):
        k = pl.program_id(1)                    # seq tile (innermost, reduction)

        @pl.when(k == 0)
        def _():
            acc_ref[...] = jnp.zeros_like(acc_ref)
            out_ref[...] = jnp.zeros_like(out_ref)

        th = thresh_ref[...]                    # (TB, 1) int32; -1 on padded rows
        lane = jax.lax.broadcasted_iota(jnp.int32, (TB, ACC_LANES), 1)
        base = k * TS

        # Pure-VALU accumulation over lane-aligned 128-wide chunks.  Garbage
        # OOB columns (col >= S) and garbage OOB rows (thresh == -1) both fail
        # `col <= th`, so no extra remainder masks are needed.
        acc = acc_ref[...]
        for j in range(n_chunks):               # static unroll
            sl = slice(j * ACC_LANES, (j + 1) * ACC_LANES)
            col = lane + (base + j * ACC_LANES)
            keep = col <= th
            prod = (logp_ref[:, sl].astype(jnp.float32)
                    * rew_ref[:, sl].astype(jnp.float32))
            acc = acc + jnp.where(keep, prod, 0.0)
        acc_ref[...] = acc

        # Single cross-lane/sublane reduce per batch tile (not per grid step).
        @pl.when(k == pl.num_programs(1) - 1)
        def _():
            out_ref[...] += jnp.sum(acc_ref[...])

    return kernel


# ----------------------------------------------------------------------------
# Tile selection
# ----------------------------------------------------------------------------
def _pick_batch_tile(B):
    if B <= 8:
        return max(int(B), 1)
    # Keep the "parallel" batch axis at >= 2 tiles (v7x megacore) when B >= 16.
    cap = max(8, ((B // 2) // 8) * 8)
    for c in (512, 256, 128, 64, 32, 16, 8):
        if c <= cap:
            return c
    return 8


def _pick_seq_tile(S):
    for c in (4096, 2048, 1024, 512, 256, 128):
        if S >= c:
            return c
    return max(int(S), 1)


# ----------------------------------------------------------------------------
# Mask -> per-row threshold prelude (plain JAX, O(B*S) read + O(B) logic)
# ----------------------------------------------------------------------------
def _mask_thresholds(sample_seqs, end_idx, B, S):
    seq = sample_seqs                    # native dtype; no int32 upcast needed
    is_end = seq == end_idx
    col = jnp.arange(S, dtype=jnp.int32)
    first_end = jnp.min(jnp.where(is_end, col[None, :], S), axis=1)      # (B,)
    has_end = first_end < S

    # Reference quirk: processing row i' (first <end> at column c) also zeroes
    # boolean-mask row c, so row i is fully un-masked iff some later row
    # i' > i has first_end[i'] == i.  O(B) scatter-max, no (B, B) tile.
    rows = jnp.arange(B, dtype=jnp.int32)
    valid = has_end & (first_end < B)
    scatter_idx = jnp.where(valid, first_end, B)          # B = dummy slot
    killer_val = jnp.where(valid, rows, -1)
    last_killer = jnp.full((B + 1,), -1, jnp.int32).at[scatter_idx].max(killer_val)
    killed = last_killer[:B] > rows

    # Keep column j of row i iff j <= thresh[i].
    thresh = jnp.where(has_end & jnp.logical_not(killed), first_end, S - 1)
    return thresh.reshape(B, 1).astype(jnp.int32)


def _reward_loss_xla(log_probs, rewards, thresh, batch_size):
    """Small-shape fallback: let XLA fuse the masked multiply-reduce."""
    S = log_probs.shape[1]
    col = jnp.arange(S, dtype=jnp.int32)[None, :]
    keep = col <= thresh
    prod = log_probs.astype(jnp.float32) * rewards.astype(jnp.float32)
    return -jnp.sum(jnp.where(keep, prod, 0.0)) / batch_size


# ----------------------------------------------------------------------------
# Public entry point
# ----------------------------------------------------------------------------
def reward_criterion(log_probs, rewards, sample_seqs, vocab, *, use_pallas=None):
    """Pallas equivalent of RewardCriterion.forward."""
    B, S = log_probs.shape
    end_idx = int(vocab['<end>'])
    # pad_idx = vocab['<pad>']  # read but unused by the reference forward.

    thresh = _mask_thresholds(sample_seqs, end_idx, B, S)          # (B, 1) int32

    if use_pallas is None:
        # Typical SCST shapes are a few hundred KB: XLA fusion wins there.
        use_pallas = (B * S) >= (1 << 20)
    if not use_pallas:
        return _reward_loss_xla(log_probs, rewards, thresh, B)

    # ---- tile selection ----------------------------------------------------
    TB = _pick_batch_tile(B)
    TS = _pick_seq_tile(S)
    itemsize = max(log_probs.dtype.itemsize, rewards.dtype.itemsize)
    # 2 streaming inputs x 2 pipeline buffers per input; keep under ~24 MiB so
    # the 32 MiB scoped-VMEM limit is safe even on v7x (64 MiB physical VMEM).
    budget = 24 * 1024 * 1024
    while 4 * TB * TS * itemsize > budget and TS > 256:
        TS //= 2
    while 4 * TB * TS * itemsize > budget and TB > 8:
        TB //= 2

    nb = pl.cdiv(B, TB)
    ns = pl.cdiv(S, TS)
    ACC_LANES = 128 if TS % 128 == 0 else TS

    # Pad thresholds to nb*TB rows with -1 so garbage OOB batch rows are
    # rejected by `col <= thresh` without any in-kernel row masking.
    pad_rows = nb * TB - B
    if pad_rows:
        thresh = jnp.concatenate(
            [thresh, jnp.full((pad_rows, 1), -1, jnp.int32)], axis=0)

    cost = pl.CostEstimate(
        flops=3 * B * S,
        transcendentals=0,
        bytes_accessed=int(log_probs.size) * int(log_probs.dtype.itemsize)
        + int(rewards.size) * int(rewards.dtype.itemsize)
        + int(thresh.size) * 4 + int(nb) * 4,
    )

    partials = pl.pallas_call(
        _make_reward_kernel(TB, TS, ACC_LANES),
        out_shape=jax.ShapeDtypeStruct((nb, 1, 1), jnp.float32),
        grid=(nb, ns),
        in_specs=[
            pl.BlockSpec((TB, 1), lambda i, k: (i, 0)),      # per-row threshold
            pl.BlockSpec((TB, TS), lambda i, k: (i, k)),     # log_probs
            pl.BlockSpec((TB, TS), lambda i, k: (i, k)),     # rewards
        ],
        out_specs=pl.BlockSpec((1, 1, 1), lambda i, k: (i, 0, 0)),
        scratch_shapes=[pltpu.VMEM((TB, ACC_LANES), jnp.float32)],
        compiler_params=pltpu.CompilerParams(
            dimension_semantics=("parallel", "arbitrary"),
            vmem_limit_bytes=32 * 1024 * 1024,
        ),
        cost_estimate=cost,
    )(thresh, log_probs, rewards)

    # Negate and scale once, outside the tiled reduction.
    return -jnp.sum(partials[:, 0, 0]) / B


# ----------------------------------------------------------------------------
# Reference + test
# ----------------------------------------------------------------------------
def _reference_torch_mimic(log_probs, rewards, sample_seqs, vocab):
    """Pure-numpy replica of the PyTorch forward (incl. fancy-index quirk)."""
    lp = np.asarray(log_probs, dtype=np.float32)
    rw = np.asarray(rewards, dtype=np.float32)
    sq = np.asarray(sample_seqs)
    end_idx = vocab['<end>']
    B = lp.shape[0]
    masks = np.ones(sq.shape, dtype=np.float32)
    bool_indexes = sq == end_idx
    end_indexes = np.argwhere(bool_indexes)   # row-major, like torch.nonzero
    previous_index = -1
    for index in end_indexes:
        r, c = int(index[0]), int(index[1])
        if previous_index == r:
            continue
        previous_index = r
        bool_indexes[[r, c], :] = False        # same advanced-indexing behavior
        bool_indexes[r, c + 1:] = True
    masks[bool_indexes] = 0.0
    reward_loss = -lp.reshape(-1) * rw.reshape(-1) * masks.reshape(-1)
    return np.sum(reward_loss) / B


if __name__ == "__main__":
    key = jax.random.PRNGKey(0)
    k1, k2 = jax.random.split(key)
    B, S = 12, 320          # exercises 2 batch tiles x 2 seq tiles (+ remainders)
    vocab = {'<pad>': 0, '<start>': 1, '<end>': 2, '<unk>': 3}

    log_probs = -jnp.abs(jax.random.normal(k1, (B, S), dtype=jnp.float32))
    rewards = jax.random.normal(k2, (B, S), dtype=jnp.float32)

    # Deterministic token ids.  Every row's first <end> column is < B so the
    # reference's fancy-indexing path stays in-bounds (the original module's
    # usable regime).  Several rows place their first <end> at a column equal
    # to an earlier row index, exercising the row-zeroing quirk; rows 5 and 9
    # have no <end> at all; every ended row also has a later, ignored <end>.
    rng = np.random.default_rng(0)
    seq_np = rng.integers(3, 10, size=(B, S)).astype(np.int32)
    end_cols = [2, 5, 0, 1, 7, None, 11, 4, 6, None, 10, 8]
    for r, c in enumerate(end_cols):
        if c is None:
            continue
        seq_np[r, c] = 2          # first <end>
        seq_np[r, c + 13] = 2     # a later <end>, skipped by the reference loop
    sample_seqs = jnp.asarray(seq_np)

    ref = _reference_torch_mimic(log_probs, rewards, sample_seqs, vocab)

    # Pallas path (forced, since the test shape is below the auto-fallback cut).
    loss_fn = jax.jit(
        lambda lp, rw, sq: reward_criterion(lp, rw, sq, vocab, use_pallas=True))
    loss = jax.block_until_ready(loss_fn(log_probs, rewards, sample_seqs))
    assert np.allclose(float(loss), float(ref), rtol=1e-4, atol=1e-4), (
        float(loss), float(ref))

    # Small-shape XLA fallback path agrees too.
    loss_xla = jax.block_until_ready(
        reward_criterion(log_probs, rewards, sample_seqs, vocab, use_pallas=False))
    assert np.allclose(float(loss_xla), float(ref), rtol=1e-4, atol=1e-4), (
        float(loss_xla), float(ref))

    print("KERNEL_OK")
</pallas_src>

<mosaic_0001>
module attributes {stable_mosaic.version = 11 : i64} {
  func.func @kernel(%arg0: i32, %arg1: i32, %arg2: memref<8x1xi32, #tpu.memory_space<vmem>>, %arg3: memref<8x256xf32, #tpu.memory_space<vmem>>, %arg4: memref<8x256xf32, #tpu.memory_space<vmem>>, %arg5: memref<1x1x1xf32, #tpu.memory_space<vmem>>, %arg6: memref<8x128xf32, #tpu.memory_space<vmem>>) attributes {dimension_semantics = [#tpu.dimension_semantics<parallel>, #tpu.dimension_semantics<arbitrary>], iteration_bounds = array<i64: 2, 2>, scalar_prefetch = 0 : i64, scratch_operands = 1 : i64, tpu.core_type = #tpu.core_type<tc>, window_params = [{transform_indices = @transform_0, window_bounds = array<i64: 8, 1>}, {transform_indices = @transform_1, window_bounds = array<i64: 8, 256>}, {transform_indices = @transform_2, window_bounds = array<i64: 8, 256>}, {transform_indices = @transform_3, window_bounds = array<i64: 1, 1, 1>}]} {
    %c0_i32 = arith.constant 0 : i32
    %0 = arith.cmpi eq, %arg1, %c0_i32 : i32
    %1 = arith.extui %0 : i1 to i32
    %c0_i32_0 = arith.constant 0 : i32
    %2 = arith.cmpi ne, %1, %c0_i32_0 : i32
    scf.if %2 {
      %cst_16 = arith.constant 0.000000e+00 : f32
      %33 = vector.broadcast %cst_16 : f32 to vector<8x128xf32>
      %c0_17 = arith.constant 0 : index
      %c0_18 = arith.constant 0 : index
      %34 = vector.load %arg6[%c0_17, %c0_18] : memref<8x128xf32, #tpu.memory_space<vmem>>, vector<8x128xf32>
      tpu.vector_store %arg6[%c0_17, %c0_18], %33 {strides = array<i32>} : memref<8x128xf32, #tpu.memory_space<vmem>>, vector<8x128xf32>,
      %cst_19 = arith.constant 0.000000e+00 : f32
      %35 = vector.broadcast %cst_19 : f32 to vector<1x1x1xf32>
      %c0_20 = arith.constant 0 : index
      %c0_21 = arith.constant 0 : index
      %c0_22 = arith.constant 0 : index
      %36 = vector.load %arg5[%c0_20, %c0_21, %c0_22] : memref<1x1x1xf32, #tpu.memory_space<vmem>>, vector<1x1x1xf32>
      tpu.vector_store %arg5[%c0_20, %c0_21, %c0_22], %35 {strides = array<i32>} : memref<1x1x1xf32, #tpu.memory_space<vmem>>, vector<1x1x1xf32>,
    } else {
    }
    %c0 = arith.constant 0 : index
    %c0_1 = arith.constant 0 : index
    %3 = vector.load %arg2[%c0, %c0_1] : memref<8x1xi32, #tpu.memory_space<vmem>>, vector<8x1xi32>
    %4 = tpu.iota {dimensions = array<i32: 1>} : vector<8x128xi32>
    %c256_i32 = arith.constant 256 : i32
    %5 = arith.muli %arg1, %c256_i32 : i32
    %c0_2 = arith.constant 0 : index
    %c0_3 = arith.constant 0 : index
    %6 = vector.load %arg6[%c0_2, %c0_3] : memref<8x128xf32, #tpu.memory_space<vmem>>, vector<8x128xf32>
    %c0_i32_4 = arith.constant 0 : i32
    %7 = arith.addi %5, %c0_i32_4 : i32
    %8 = vector.broadcast %7 : i32 to vector<8x128xi32>
    %9 = arith.addi %4, %8 : vector<8x128xi32>
    %10 = vector.broadcast %3 : vector<8x1xi32> to vector<8x128xi32>
    %11 = arith.cmpi sle, %9, %10 : vector<8x128xi32>
    %c0_5 = arith.constant 0 : index
    %c0_6 = arith.constant 0 : index
    %12 = vector.load %arg3[%c0_5, %c0_6] : memref<8x256xf32, #tpu.memory_space<vmem>>, vector<8x128xf32>
    %c0_7 = arith.constant 0 : index
    %c0_8 = arith.constant 0 : index
    %13 = vector.load %arg4[%c0_7, %c0_8] : memref<8x256xf32, #tpu.memory_space<vmem>>, vector<8x128xf32>
    %14 = arith.mulf %12, %13 : vector<8x128xf32>
    %cst = arith.constant 0.000000e+00 : f32
    %15 = vector.broadcast %cst : f32 to vector<8x128xf32>
    %16 = arith.select %11, %14, %15 : vector<8x128xi1>, vector<8x128xf32>
    %17 = arith.addf %6, %16 : vector<8x128xf32>
    %c128_i32 = arith.constant 128 : i32
    %18 = arith.addi %5, %c128_i32 : i32
    %19 = vector.broadcast %18 : i32 to vector<8x128xi32>
    %20 = arith.addi %4, %19 : vector<8x128xi32>
    %21 = vector.broadcast %3 : vector<8x1xi32> to vector<8x128xi32>
    %22 = arith.cmpi sle, %20, %21 : vector<8x128xi32>
    %c0_9 = arith.constant 0 : index
    %c128 = arith.constant 128 : index
    %23 = vector.load %arg3[%c0_9, %c128] : memref<8x256xf32, #tpu.memory_space<vmem>>, vector<8x128xf32>
    %c0_10 = arith.constant 0 : index
    %c128_11 = arith.constant 128 : index
    %24 = vector.load %arg4[%c0_10, %c128_11] : memref<8x256xf32, #tpu.memory_space<vmem>>, vector<8x128xf32>
    %25 = arith.mulf %23, %24 : vector<8x128xf32>
    %cst_12 = arith.constant 0.000000e+00 : f32
    %26 = vector.broadcast %cst_12 : f32 to vector<8x128xf32>
    %27 = arith.select %22, %25, %26 : vector<8x128xi1>, vector<8x128xf32>
    %28 = arith.addf %17, %27 : vector<8x128xf32>
    %c0_13 = arith.constant 0 : index
    %c0_14 = arith.constant 0 : index
    %29 = vector.load %arg6[%c0_13, %c0_14] : memref<8x128xf32, #tpu.memory_space<vmem>>, vector<8x128xf32>
    tpu.vector_store %arg6[%c0_13, %c0_14], %28 {strides = array<i32>} : memref<8x128xf32, #tpu.memory_space<vmem>>, vector<8x128xf32>,
    %c1_i32 = arith.constant 1 : i32
    %30 = arith.cmpi eq, %arg1, %c1_i32 : i32
    %31 = arith.extui %30 : i1 to i32
    %c0_i32_15 = arith.constant 0 : i32
    %32 = arith.cmpi ne, %31, %c0_i32_15 : i32
    scf.if %32 {
      %c0_16 = arith.constant 0 : index
      %c0_17 = arith.constant 0 : index
      %c0_18 = arith.constant 0 : index
      %33 = vector.load %arg5[%c0_16, %c0_17, %c0_18] : memref<1x1x1xf32, #tpu.memory_space<vmem>>, vector<1x1x1xf32>
      %c0_19 = arith.constant 0 : index
      %c0_20 = arith.constant 0 : index
      %34 = vector.load %arg6[%c0_19, %c0_20] : memref<8x128xf32, #tpu.memory_space<vmem>>, vector<8x128xf32>
      %35 = vector.shape_cast %34 : vector<8x128xf32> to vector<1x8x128xf32>
      %cst_21 = arith.constant dense<0.000000e+00> : vector<1xf32>
      %36 = vector.multi_reduction <add>, %35, %cst_21 [1, 2] : vector<1x8x128xf32> to vector<1xf32>
      %37 = vector.shape_cast %36 : vector<1xf32> to vector<1x1x1xf32>
      %38 = vector.extract %37[0, 0, 0] : f32 from vector<1x1x1xf32>
      %39 = vector.broadcast %38 : f32 to vector<1x1x1xf32>
      %40 = arith.addf %33, %39 : vector<1x1x1xf32>
      %c0_22 = arith.constant 0 : index
      %c0_23 = arith.constant 0 : index
      %c0_24 = arith.constant 0 : index
      %41 = vector.load %arg5[%c0_22, %c0_23, %c0_24] : memref<1x1x1xf32, #tpu.memory_space<vmem>>, vector<1x1x1xf32>
      tpu.vector_store %arg5[%c0_22, %c0_23, %c0_24], %40 {strides = array<i32>} : memref<1x1x1xf32, #tpu.memory_space<vmem>>, vector<1x1x1xf32>,
    } else {
    }
    return
  }
  func.func @transform_0(%arg0: i32, %arg1: i32) -> (i32, i32) {
    %c0_i32 = arith.constant 0 : i32
    %c0_i32_0 = arith.constant 0 : i32
    return %arg0, %c0_i32 : i32, i32
  }
  func.func @transform_1(%arg0: i32, %arg1: i32) -> (i32, i32) {
    %c0_i32 = arith.constant 0 : i32
    return %arg0, %arg1 : i32, i32
  }
  func.func @transform_2(%arg0: i32, %arg1: i32) -> (i32, i32) {
    %c0_i32 = arith.constant 0 : i32
    return %arg0, %arg1 : i32, i32
  }
  func.func @transform_3(%arg0: i32, %arg1: i32) -> (i32, i32, i32) {
    %c0_i32 = arith.constant 0 : i32
    %c0_i32_0 = arith.constant 0 : i32
    %c0_i32_1 = arith.constant 0 : i32
    return %arg0, %c0_i32, %c0_i32_0 : i32, i32, i32
  }
}

</mosaic_0001>

<bundles_post_ra>
// kernel: _lambda_.1
= control target key start
LH: loop header
LB: loop body
LE: loop exit
PB: predicated region body
PF: predicated region fallthrough
CT: control target
= control target key end

     0   :  { %s557_s12 = smov 0   ;;  %s559_s13 = smov 0   ;;  %s625_s0 = inlined_call_operand.vmem [shape: s32[16,1], index: 0, kind: input, shape index: {}]   ;;  %s626_s1 = inlined_call_operand.vmem [shape: f32[12,320], index: 1, kind: input, shape index: {}]   ;;  %s627_s2 = inlined_call_operand.vmem [shape: f32[12,320], index: 2, kind: input, shape index: {}]   ;;  %s628_s3 = inlined_call_operand.vmem [shape: f32[2,1,1], index: 3, kind: output, shape index: {}]  }
   0x1   :  { %s561_s14 = smov 0   ;;  %s563_s15 = smov 0  }
   0x2   :  { %s565_s16 = smov 0  }
   0x3 LB: > { %s22_s17 = sadd.s32 1, %s525_s14  ;;  %s25_s18 = sadd.s32 1, %s529_s15  ;;  %s533_s16 = sphi %s565_s16, %s13_s16   ;;  %s529_s15 = sphi %s563_s15, %s632_s15   ;;  %s525_s14 = sphi %s561_s14, %s631_s14   ;;  %s521_s13 = sphi %s559_s13, %s630_s13   ;;  %s517_s12 = sphi %s557_s12, %s629_s12  }
   0x4   : > { %p23_p0 = scmp.ge.s32.totalorder %s22_s17, 2  ;;  %p438_p1 = scmp.ge.s32.totalorder %s533_s16, 1 }
   0x5   : > { %p198_p2 = scmp.lt.s32.totalorder %s533_s16, 5 }
   0x6   : > { %s634_s17 = smov (%p23_p0, %s22_s17), 0  ;;  %s636_s18 = smov (!%p23_p0, %s25_s18), %s529_s15 }
   0x7   : > { %p199_p3 = pnand %p438_p1, %p198_p2  ;;  %p27_p4 = scmp.ge.s32.totalorder %s636_s18, 2 }
   0x8   : > { %p245_p5 = scmp.lt.s32.totalorder (!%p199_p3), %s521_s13, 1  ;;  %s440_s19 = sshll.u32 (!%p199_p3), %s517_s12, 1 }
   0x9   : > { %s638_s18 = smov (%p27_p4, %s636_s18), 0  ;;  %202 = sbr.rel (%p199_p3) target bundleno = 378 (0x17a), region = 32 }
   0xa   : > { %p256_p6 = scmp.lt.s32.totalorder (!%p199_p3), %s440_s19, 2  ;;  %p444_p7 = scmp.ne.s32.totalorder (!%p199_p3), %s517_s12, 0 }
  0x10   : > { %s640_s13 = smov (!%p245_p5, %s521_s13), 1  ;;  %s642_s19 = smov (!%p256_p6, %s440_s19), 2 }
  0x11   : > { %s439_s20 = sshll.u32 %s640_s13, 3  ;;  %s449_s21 = smul.u32 3, %s640_s13  ;;  %vm293_vm0 = vcmask (!%p444_p7), 0   ;;  %v535_v0 = vmov (!%p444_p7), 0.0  }
  0x12   : > { %s248_s24 = scalar_lea.vmem %s625_s0, %s439_s20  ;;  %s596_s27 = scalar_lea.vmem %s628_s3, %s640_s13  ;;  %292 = vst [vmem:[#allocation2] sm:$0xff] (!%p444_p7), %v535_v0 }
  0x13   : > { %s259_s28 = sadd.s32 %s449_s21, %s642_s19  ;;  %291 = sbr.rel (%p444_p7) target bundleno = 26 (0x1a), region = 36  ;;  %294 = vst.msk [vmem:[%s596_s27] sm:$0x1] (!%p444_p7), %vm293_vm0, %v535_v0 }
  0x14   : > { %s441_s29 = sshll.u32 %s259_s28, 3 }
  0x15   : > { %s261_s5 = scalar_lea.vmem %s626_s1, %s441_s29  ;;  %s279_s8 = scalar_lea.vmem %s627_s2, %s441_s29 }
  0x1a PF: > { %v295_v1 = vld [vmem:[%s248_s24] sm:$0xff]  ;;  %v536_v2 = vmov 0   ;;  %s445_s9 = sshll.u32 %s517_s12, 8  ;;  %v296_v3 = vlaneseq  ;;  %v315_v11 = vld [vmem:[%s261_s5 + $0x8] sm:$0xff]  ;;  %p446_p8 = scmp.ne.s32.totalorder %s517_s12, 1 }
  0x1b   : > { %494 = vset.pattern.permute.xlu0 %v536_v2  ;;  %s311_s10 = sadd.s32 128, %s445_s9  ;;  %v300_v5 = vstv %s445_s9  ;;  %v306_v7 = vld [vmem:[%s261_s5] sm:$0xff]  ;;  %v316_v12 = vld [vmem:[%s279_s8 + $0x8] sm:$0xff]  ;;  %vm338_vm3 = vcmask (!%p446_p8), 0  }
  0x1c   : > { %303 = vperm.xlu0 %494, %v295_v1   ;;  %v297_v4 = vand.u32 127, %v296_v3  ;;  %v312_v6 = vstv %s311_s10  ;;  %v307_v8 = vld [vmem:[%s279_s8] sm:$0xff]  ;;  %v317_v15 = vmul.f32 %v316_v12, %v315_v11 }
  0x1d   : > { %v308_v13 = vmul.f32 %v307_v8, %v306_v7  ;;  %v299_v14 = vld [vmem:[#allocation2] sm:$0xff] }
  0x1e   : > { %v301_v9 = vadd.s32 %v300_v5, %v297_v4  ;;  %v313_v10 = vadd.s32 %v312_v6, %v297_v4  ;;  %v325_v29 = vld [vmem:[%s596_s27] sm:$0x1] (!%p446_p8) }
  0x9b   : > { %v304_v16 = vpop.permute.xlu0 %303 }
  0x9c   : > { %vm305_vm1 = vcmp.le.s32.totalorder %v301_v9, %v304_v16  ;;  %vm314_vm2 = vcmp.le.s32.totalorder %v313_v10, %v304_v16  ;;  %324 = sbr.rel (%p446_p8) target bundleno = 378 (0x17a), region = 40 }
  0x9d   : > { %v309_v17 = vsel %vm305_vm1, %v308_v13, 0.0  ;;  %v318_v19 = vsel %vm314_vm2, %v317_v15, 0.0 }
  0x9e   : > { %v310_v18 = vadd.f32 %v309_v17, %v299_v14 }
  0xa0   : > { %v319_v20 = vadd.f32 %v318_v19, %v310_v18 }
  0xa2   : > { %320 = vst [vmem:[#allocation2] sm:$0xff] %v319_v20 }
  0xa9   : > { %v326_v21 = vld [vmem:[#allocation2] sm:$0xff] }
  0xaa   : > { %327 = vadd.xlane.f32.xlu0 %v326_v21 }
 0x137   : > { %v328_v22 = vpop.xlane.xlu0 %327 }
 0x138   : > { %v329_v23 = vrot.slane %v328_v22, 4 }
 0x13a   : > { %v330_v24 = vadd.f32 %v329_v23, %v328_v22 }
 0x13c   : > { %v331_v25 = vrot.slane %v330_v24, 2 }
 0x13e   : > { %v332_v26 = vadd.f32 %v331_v25, %v330_v24 }
 0x140   : > { %v333_v27 = vrot.slane %v332_v26, 1 }
 0x142   : > { %v334_v28 = vadd.f32 %v333_v27, %v332_v26 }
 0x144   : > { %450 = vpush %v334_v28 }
 0x175   : > { %s451_s11 = spop %450 }
 0x176   : > { %v336_v30 = vstv %s451_s11 }
 0x177   : > { %v337_v31 = vadd.f32 %v336_v30, %v325_v29 }
 0x179   : > { %339 = vst.msk [vmem:[%s596_s27] sm:$0x1] %vm338_vm3, %v337_v31 }
 0x17a PF: > { %s13_s16 = sadd.s32 1, %s533_s16   ;;  %s629_s12 = smov %s525_s14 }
 0x17b   : > { %p10_p9 = scmp.ge.s32.totalorder %s13_s16, 6   ;;  %s630_s13 = smov %s529_s15 }
 0x17c   : > { %s631_s14 = smov %s634_s17  ;;  %s632_s15 = smov %s638_s18 }
 0x17d   :  { %12 = sbr.rel (!%p10_p9) target bundleno = 3 (0x3), region = 76 }

</bundles_post_ra>
